<compile_context>
chip_gen: v6e
topology: v6e:2x2x1
jax: 0.10.0
libtpu: 0.0.40
codegen_flags: <defaults>
</compile_context>

<pallas_src>
import functools

import jax
import jax.numpy as jnp
from jax import lax
from jax.experimental import pallas as pl
from jax.experimental.pallas import tpu as pltpu

_LANE = 128
_NEG_BIG = -1e30  # pad value for vocab columns: exp(pad - max) underflows to 0


def _gather_rows(idx_sref, table_ref, logits_ref, base, tm):
    """logits_ref[r, :] = table_ref[idx[base + r], :] for r in [0, tm)."""

    def body(r, carry):
        tok = idx_sref[base + r]                       # scalar read from SMEM
        logits_ref[pl.ds(r, 1), :] = table_ref[pl.ds(tok, 1), :]
        return carry

    lax.fori_loop(0, tm, body, 0)


def _bigram_logits_kernel(idx_sref, table_ref, logits_ref):
    i = pl.program_id(0)
    tm = logits_ref.shape[0]
    _gather_rows(idx_sref, table_ref, logits_ref, i * tm, tm)


def _bigram_loss_kernel(idx_sref, tgt_ref, table_ref, logits_ref, loss_ref,
                        acc_ref, *, bt_true):
    i = pl.program_id(0)
    tm, vp = logits_ref.shape
    base = i * tm

    @pl.when(i == 0)
    def _():
        acc_ref[0] = jnp.float32(0.0)

    # Embedding lookup: row gather from the VMEM-resident table.
    _gather_rows(idx_sref, table_ref, logits_ref, base, tm)

    # Fused cross-entropy partial sum for this tile (single f32 pass).
    logits = logits_ref[...]                                   # [tm, vp]
    tgt = tgt_ref[...]                                         # [tm, 1] int32
    lane = lax.broadcasted_iota(jnp.int32, (tm, vp), 1)
    row = lax.broadcasted_iota(jnp.int32, (tm, 1), 0)
    valid = (base + row) < bt_true                             # mask padded rows

    m = jnp.max(logits, axis=-1, keepdims=True)
    lse = m + jnp.log(jnp.sum(jnp.exp(logits - m), axis=-1, keepdims=True))
    tgt_logit = jnp.sum(jnp.where(lane == tgt, logits, 0.0), axis=-1,
                        keepdims=True)
    per_row = jnp.where(valid, lse - tgt_logit, 0.0)
    acc_ref[0] += jnp.sum(per_row)

    @pl.when(i == pl.num_programs(0) - 1)
    def _():
        loss_ref[0, 0] = acc_ref[0] / jnp.float32(bt_true)


@functools.partial(jax.jit, static_argnames=("with_targets", "tm"))
def bigram_forward(idx, table, targets=None, *, with_targets=True, tm=256):
    """Pallas implementation of BigramLanguageModel.forward.

    Returns (logits [B, T, V] f32, loss scalar f32 or None).
    """
    B, T = idx.shape
    V = table.shape[0]
    BT = B * T

    tm = max(8, (int(tm) // 8) * 8)                    # sublane multiple
    vp = ((V + _LANE - 1) // _LANE) * _LANE            # lane-dense vocab dim
    bt_pad = ((BT + tm - 1) // tm) * tm
    grid = (bt_pad // tm,)

    # Lane-dense padded table; padded columns contribute 0 to the softmax sum
    # and are sliced off outside the kernel.
    table_p = jnp.pad(table.astype(jnp.float32), ((0, 0), (0, vp - V)),
                      constant_values=_NEG_BIG)
    idx_flat = jnp.pad(idx.reshape(-1).astype(jnp.int32), (0, bt_pad - BT))

    table_bytes = V * vp * 4
    tile_bytes = tm * vp * 4
    # table residency + double-buffered logits tiles + small blocks + slack.
    vmem_limit = int(min(table_bytes + 4 * tile_bytes + 8 * tm + (4 << 20),
                         48 * 1024 * 1024))

    if with_targets:
        tgt_flat = jnp.pad(targets.reshape(-1).astype(jnp.int32),
                           (0, bt_pad - BT)).reshape(bt_pad, 1)
        cost = pl.CostEstimate(
            flops=6 * bt_pad * vp,
            transcendentals=bt_pad * vp + bt_pad,
            bytes_accessed=bt_pad * vp * 4 + table_bytes + 8 * bt_pad + 4)
        logits_p, loss = pl.pallas_call(
            functools.partial(_bigram_loss_kernel, bt_true=BT),
            out_shape=(jax.ShapeDtypeStruct((bt_pad, vp), jnp.float32),
                       jax.ShapeDtypeStruct((1, 1), jnp.float32)),
            grid_spec=pltpu.PrefetchScalarGridSpec(
                num_scalar_prefetch=1,          # idx -> SMEM, drives the gather
                grid=grid,
                in_specs=[
                    pl.BlockSpec((tm, 1), lambda i, idx_s: (i, 0)),   # targets
                    pl.BlockSpec((V, vp), lambda i, idx_s: (0, 0)),   # table
                ],
                out_specs=(
                    pl.BlockSpec((tm, vp), lambda i, idx_s: (i, 0)),  # logits
                    pl.BlockSpec(memory_space=pltpu.MemorySpace.SMEM),  # loss
                ),
                scratch_shapes=[pltpu.SMEM((1,), jnp.float32)],
            ),
            compiler_params=pltpu.CompilerParams(
                dimension_semantics=("arbitrary",),  # loss accumulates over BT
                vmem_limit_bytes=vmem_limit),
            cost_estimate=cost,
        )(idx_flat, tgt_flat, table_p)
        logits = logits_p[:BT, :V].reshape(B, T, V)
        return logits, loss[0, 0]

    cost = pl.CostEstimate(
        flops=bt_pad,
        transcendentals=0,
        bytes_accessed=bt_pad * vp * 4 + table_bytes + 4 * bt_pad)
    logits_p = pl.pallas_call(
        _bigram_logits_kernel,
        out_shape=jax.ShapeDtypeStruct((bt_pad, vp), jnp.float32),
        grid_spec=pltpu.PrefetchScalarGridSpec(
            num_scalar_prefetch=1,
            grid=grid,
            in_specs=[pl.BlockSpec((V, vp), lambda i, idx_s: (0, 0))],
            out_specs=pl.BlockSpec((tm, vp), lambda i, idx_s: (i, 0)),
        ),
        compiler_params=pltpu.CompilerParams(
            dimension_semantics=("parallel",),  # independent tiles -> megacore
            vmem_limit_bytes=vmem_limit),
        cost_estimate=cost,
    )(idx_flat, table_p)
    logits = logits_p[:BT, :V].reshape(B, T, V)
    return logits, None


if __name__ == "__main__":
    # Small deterministic problem: batch=2, seq=8, vocab=64.
    B, T, V = 2, 8, 64
    key = jax.random.PRNGKey(0)
    k_table, k_idx, k_tgt = jax.random.split(key, 3)

    # nn.Embedding(vocab_size, vocab_size).weight ~ N(0, 1)
    table = jax.random.normal(k_table, (V, V), dtype=jnp.float32)
    idx = jax.random.randint(k_idx, (B, T), 0, V, dtype=jnp.int32)
    targets = jax.random.randint(k_tgt, (B, T), 0, V, dtype=jnp.int32)

    # Small tile so the 2x8 example exercises a multi-step grid (BT=16, TM=8).
    logits, loss = bigram_forward(idx, table, targets, with_targets=True, tm=8)
    jax.block_until_ready((logits, loss))

    # targets=None branch (logits only, loss=None).
    logits_only, loss_none = bigram_forward(idx, table, with_targets=False, tm=8)
    jax.block_until_ready(logits_only)

    # Reference check in plain JAX.
    ref_logits = table[idx]                                    # [B, T, V]
    ref_flat = ref_logits.reshape(B * T, V)
    ref_lse = jax.nn.logsumexp(ref_flat, axis=-1)
    ref_loss = jnp.mean(ref_lse - ref_flat[jnp.arange(B * T),
                                           targets.reshape(-1)])

    assert jnp.allclose(logits, ref_logits, atol=1e-5), "logits mismatch"
    assert jnp.allclose(logits_only, ref_logits, atol=1e-5), "logits-only mismatch"
    assert jnp.allclose(loss, ref_loss, atol=1e-5), "loss mismatch"
    assert loss_none is None

    print("KERNEL_OK")
</pallas_src>

<mosaic_0001>
module attributes {stable_mosaic.version = 11 : i64} {
  func.func @_bigram_loss_kernel(%arg0: i32, %arg1: memref<16xi32, #tpu.memory_space<smem>>, %arg2: memref<8x1xi32, #tpu.memory_space<vmem>>, %arg3: memref<64x128xf32, #tpu.memory_space<vmem>>, %arg4: memref<8x128xf32, #tpu.memory_space<vmem>>, %arg5: memref<1x1xf32, #tpu.memory_space<smem>>, %arg6: memref<1xf32, #tpu.memory_space<smem>>) attributes {dimension_semantics = [#tpu.dimension_semantics<arbitrary>], iteration_bounds = array<i64: 2>, scalar_prefetch = 1 : i64, scratch_operands = 1 : i64, tpu.core_type = #tpu.core_type<tc>, window_params = [{transform_indices = @transform_0, window_bounds = array<i64: 8, 1>}, {pipeline_mode = #tpu.pipeline_mode<synchronous>, transform_indices = @transform_1, window_bounds = array<i64: 64, 128>}, {transform_indices = @transform_2, window_bounds = array<i64: 8, 128>}, {transform_indices = @transform_3, window_bounds = array<i64: 1, 1>}]} {
    %c8_i32 = arith.constant 8 : i32
    %0 = arith.muli %arg0, %c8_i32 : i32
    %c0_i32 = arith.constant 0 : i32
    %1 = arith.cmpi eq, %arg0, %c0_i32 : i32
    %2 = arith.extui %1 : i1 to i32
    %c0_i32_0 = arith.constant 0 : i32
    %3 = arith.cmpi ne, %2, %c0_i32_0 : i32
    scf.if %3 {
      %cst_16 = arith.constant 0.000000e+00 : f32
      %c0_17 = arith.constant 0 : index
      %41 = memref.load %arg6[%c0_17] : memref<1xf32, #tpu.memory_space<smem>>
      memref.store %cst_16, %arg6[%c0_17] : memref<1xf32, #tpu.memory_space<smem>>
    } else {
    }
    %c0_i32_1 = arith.constant 0 : i32
    %c8_i32_2 = arith.constant 8 : i32
    %4 = arith.addi %c0_i32_1, %c8_i32_2 : i32
    %c1_i32 = arith.constant 1 : i32
    scf.for %arg7 = %c0_i32_1 to %4 step %c1_i32  : i32 {
      %41 = arith.addi %0, %arg7 : i32
      %42 = arith.index_cast %41 : i32 to index
      %43 = memref.load %arg1[%42] : memref<16xi32, #tpu.memory_space<smem>>
      %44 = arith.index_cast %43 : i32 to index
      %c0_16 = arith.constant 0 : index
      %45 = vector.load %arg3[%44, %c0_16] : memref<64x128xf32, #tpu.memory_space<vmem>>, vector<1x128xf32>
      %46 = arith.index_cast %arg7 : i32 to index
      %c0_17 = arith.constant 0 : index
      %47 = vector.load %arg4[%46, %c0_17] : memref<8x128xf32, #tpu.memory_space<vmem>>, vector<1x128xf32>
      tpu.vector_store %arg4[%46, %c0_17], %45 {strides = array<i32>} : memref<8x128xf32, #tpu.memory_space<vmem>>, vector<1x128xf32>,
    }
    %c8_i32_3 = arith.constant 8 : i32
    %c0 = arith.constant 0 : index
    %c0_4 = arith.constant 0 : index
    %5 = vector.load %arg4[%c0, %c0_4] : memref<8x128xf32, #tpu.memory_space<vmem>>, vector<8x128xf32>
    %c0_5 = arith.constant 0 : index
    %c0_6 = arith.constant 0 : index
    %6 = vector.load %arg2[%c0_5, %c0_6] : memref<8x1xi32, #tpu.memory_space<vmem>>, vector<8x1xi32>
    %7 = tpu.iota {dimensions = array<i32: 1>} : vector<8x128xi32>
    %8 = tpu.iota {dimensions = array<i32: 0>} : vector<8x1xi32>
    %9 = vector.broadcast %0 : i32 to vector<8x1xi32>
    %10 = arith.addi %9, %8 : vector<8x1xi32>
    %c16_i32 = arith.constant 16 : i32
    %11 = vector.broadcast %c16_i32 : i32 to vector<8x1xi32>
    %12 = arith.cmpi slt, %10, %11 : vector<8x1xi32>
    %cst = arith.constant dense<0xFF800000> : vector<8xf32>
    %13 = vector.multi_reduction <maximumf>, %5, %cst [1] : vector<8x128xf32> to vector<8xf32>
    %14 = vector.shape_cast %13 : vector<8xf32> to vector<8x1xf32>
    %15 = vector.broadcast %14 : vector<8x1xf32> to vector<8x128xf32>
    %16 = arith.subf %5, %15 : vector<8x128xf32>
    %17 = math.exp %16 : vector<8x128xf32>
    %cst_7 = arith.constant dense<0.000000e+00> : vector<8xf32>
    %18 = vector.multi_reduction <add>, %17, %cst_7 [1] : vector<8x128xf32> to vector<8xf32>
    %19 = vector.shape_cast %18 : vector<8xf32> to vector<8x1xf32>
    %20 = math.log %19 : vector<8x1xf32>
    %21 = arith.addf %14, %20 : vector<8x1xf32>
    %22 = vector.broadcast %6 : vector<8x1xi32> to vector<8x128xi32>
    %23 = arith.cmpi eq, %7, %22 : vector<8x128xi32>
    %cst_8 = arith.constant 0.000000e+00 : f32
    %24 = vector.broadcast %cst_8 : f32 to vector<8x128xf32>
    %25 = arith.select %23, %5, %24 : vector<8x128xi1>, vector<8x128xf32>
    %cst_9 = arith.constant dense<0.000000e+00> : vector<8xf32>
    %26 = vector.multi_reduction <add>, %25, %cst_9 [1] : vector<8x128xf32> to vector<8xf32>
    %27 = vector.shape_cast %26 : vector<8xf32> to vector<8x1xf32>
    %28 = arith.subf %21, %27 : vector<8x1xf32>
    %cst_10 = arith.constant 0.000000e+00 : f32
    %29 = vector.broadcast %cst_10 : f32 to vector<8x1xf32>
    %30 = arith.select %12, %28, %29 : vector<8x1xi1>, vector<8x1xf32>
    %c0_11 = arith.constant 0 : index
    %31 = memref.load %arg6[%c0_11] : memref<1xf32, #tpu.memory_space<smem>>
    %32 = vector.shape_cast %30 : vector<8x1xf32> to vector<1x8x1xf32>
    %cst_12 = arith.constant dense<0.000000e+00> : vector<1xf32>
    %33 = vector.multi_reduction <add>, %32, %cst_12 [1, 2] : vector<1x8x1xf32> to vector<1xf32>
    %34 = vector.shape_cast %33 : vector<1xf32> to vector<1x1x1xf32>
    %35 = vector.extract %34[0, 0, 0] : f32 from vector<1x1x1xf32>
    %36 = arith.addf %31, %35 : f32
    %c0_13 = arith.constant 0 : index
    %37 = memref.load %arg6[%c0_13] : memref<1xf32, #tpu.memory_space<smem>>
    memref.store %36, %arg6[%c0_13] : memref<1xf32, #tpu.memory_space<smem>>
    %c1_i32_14 = arith.constant 1 : i32
    %38 = arith.cmpi eq, %arg0, %c1_i32_14 : i32
    %39 = arith.extui %38 : i1 to i32
    %c0_i32_15 = arith.constant 0 : i32
    %40 = arith.cmpi ne, %39, %c0_i32_15 : i32
    scf.if %40 {
      %c0_16 = arith.constant 0 : index
      %41 = memref.load %arg6[%c0_16] : memref<1xf32, #tpu.memory_space<smem>>
      %cst_17 = arith.constant 1.600000e+01 : f32
      %42 = arith.divf %41, %cst_17 : f32
      %c0_18 = arith.constant 0 : index
      %c0_19 = arith.constant 0 : index
      %43 = memref.load %arg5[%c0_18, %c0_19] : memref<1x1xf32, #tpu.memory_space<smem>>
      memref.store %42, %arg5[%c0_18, %c0_19] : memref<1x1xf32, #tpu.memory_space<smem>>
    } else {
    }
    return
  }
  func.func @transform_0(%arg0: i32, %arg1: memref<16xi32, #tpu.memory_space<smem>>) -> (i32, i32) {
    %c0_i32 = arith.constant 0 : i32
    %c0_i32_0 = arith.constant 0 : i32
    return %arg0, %c0_i32 : i32, i32
  }
  func.func @transform_1(%arg0: i32, %arg1: memref<16xi32, #tpu.memory_space<smem>>) -> (i32, i32) {
    %c0_i32 = arith.constant 0 : i32
    %c0_i32_0 = arith.constant 0 : i32
    %c0_i32_1 = arith.constant 0 : i32
    return %c0_i32, %c0_i32_0 : i32, i32
  }
  func.func @transform_2(%arg0: i32, %arg1: memref<16xi32, #tpu.memory_space<smem>>) -> (i32, i32) {
    %c0_i32 = arith.constant 0 : i32
    %c0_i32_0 = arith.constant 0 : i32
    return %arg0, %c0_i32 : i32, i32
  }
  func.func @transform_3(%arg0: i32, %arg1: memref<16xi32, #tpu.memory_space<smem>>) -> (i32, i32) {
    %c0_i32 = arith.constant 0 : i32
    %c0_i32_0 = arith.constant 0 : i32
    %c0_i32_1 = arith.constant 0 : i32
    return %c0_i32, %c0_i32_0 : i32, i32
  }
}

</mosaic_0001>

<bundles_post_ra>
// kernel: bigram_forward.1
= control target key start
LH: loop header
LB: loop body
LE: loop exit
PB: predicated region body
PF: predicated region fallthrough
CT: control target
= control target key end

     0   :  { %s490_s0 = inlined_call_operand.vmem [shape: s32[16], index: 0, kind: input, shape index: {}]   ;;  %s491_s1 = inlined_call_operand.vmem [shape: s32[16,1], index: 1, kind: input, shape index: {}]   ;;  %s492_s2 = inlined_call_operand.vmem [shape: f32[64,128], index: 2, kind: input, shape index: {}]   ;;  %s493_s3 = inlined_call_operand.vmem [shape: f32[16,128], index: 3, kind: output, shape index: {0}]   ;;  %s494_s4 = inlined_call_operand.hbm [shape: f32[1,1], index: 4, kind: output, shape index: {1}]  }
   0x1   :  { %s10_s17 = sshll.u32 %s490_s0, 4  ;;  %s11_s17 = int_to_ptr.vmem [resolvable:$true] %s10_s17 }
   0x2   :  { %s380_s18 = scalar_lea.vmem %s11_s17, 16  ;;  %p385_p1 = scmp.lt.s32.totalorder %s11_s17, %s11_s17 }
   0x3   :  { %p381_p0 = scmp.ne.s32.totalorder %s11_s17, %s380_s18  ;;  %p386_p2 = scmp.lt.s32.totalorder %s380_s18, %s380_s18 }
   0x5   :  { %p387_p3 = por %p386_p2, %p385_p1 }
   0x7   :  { %p388_p4 = pnand %p387_p3, %p381_p0 }
   0x9   :  { %391 = shalt.err (!%p388_p4)  }
   0xa   :  { %s424_s19 = smov [#allocation4]  }
   0xb   :  { %13 = dma.vmem_to_smem %s11_s17, 16, %s424_s19, [#allocation3] }
   0xc   :  { %410 = dma.done.wait [#allocation3], 16 }
   0xd   :  { %411 = vsyncadd [#allocation3], 4294967280 }
   0xe   :  { %15 = sfence }
   0xf   :  { %16 = vsyncpa [#allocation6], 0  ;;  %s456_s20 = smov 0  }
  0x10 LB: > { %s462_s0 = sadd.s32 4294967295, %s418_s20   ;;  %p331_p5 = scmp.ge.s32.totalorder %s418_s20, 1  ;;  %s418_s20 = sphi %s456_s20, %s22_s20  }
  0x11   : > { %p142_p6 = scmp.lt.s32.totalorder %s418_s20, 3 }
  0x13   : > { %p143_p7 = pnand %p331_p5, %p142_p6 }
  0x14   : > { %p164_p8 = scmp.lt.s32.totalorder (!%p143_p7), %s462_s0, 1  ;;  %s334_s21 = sshll.u32 (!%p143_p7), %s462_s0, 3 }
  0x15   : > { %146 = sbr.rel (%p143_p7) target bundleno = 572 (0x23c), region = 28  ;;  %p351_p9 = scmp.eq.s32.totalorder (!%p143_p7), %s462_s0, 0 }
  0x16   : > { %s425_s24 = smov (!%p143_p7), 0.0   ;;  %s420_s5 = smov (!%p143_p7), 0  }
  0x1a   : > { %s165_s22 = scalar_select %p164_p8, %s462_s0, 1 }
  0x1b   : > { %344 = sst [smem:[#allocation2]] (%p351_p9), %s425_s24 }
  0x1c   : > { %s332_s23 = sshll.u32 %s165_s22, 3 }
  0x1d   : > { %s167_s27 = scalar_lea.vmem %s491_s1, %s332_s23  ;;  %s171_s30 = scalar_lea.vmem %s493_s3, %s332_s23 }
  0x1e LB: >> { %s185_s6 = sadd.s32 %s422_s5, %s334_s21  ;;  %s189_s8 = scalar_lea.vmem %s171_s30, %s422_s5  ;;  %s422_s5 = sphi %s420_s5, %s184_s5  }
  0x1f   : >> { %s186_s7 = sld [smem:[#allocation4 + %s185_s6]]  ;;  %s184_s5 = sadd.s32 1, %s422_s5  }
  0x20   : >> { %p181_p10 = scmp.ge.s32.totalorder %s184_s5, 8  }
  0x21   : > { %v426_v2 = vmov (%p181_p10), 0   ;;  %v192_v3 = vld [vmem:[%s167_s27] sm:$0xff] (%p181_p10)  ;;  %v193_v7 = vlaneseq (%p181_p10)  ;;  %v197_v14 = vstv (%p181_p10), %s334_s21  ;;  %vm220_vm2 = vcmask (%p181_p10), 7168   ;;  %s219_s12 = sld [smem:[#allocation2]] (%p181_p10)  ;;  %p352_p11 = scmp.eq.s32.totalorder (%p181_p10), %s462_s0, 1 }
  0x22   : > { %375 = vset.pattern.permute.xlu0 (%p181_p10), %v426_v2  ;;  %s427_s16 = smov (%p181_p10), [#allocation5]  }
  0x23   : > { %183 = sbr.rel (!%p181_p10) target bundleno = 30 (0x1e), region = 87  ;;  %v194_v8 = vand.u32 (%p181_p10), 127, %v193_v7  ;;  %v196_v13 = vshrl.u32 (%p181_p10), %v193_v7, 7 }
  0x25   : >> { %s187_s11 = scalar_lea.vmem %s492_s2, %s186_s7  ;;  %v198_v16 = vadd.s32 (%p181_p10), %v197_v14, %v196_v13 }
  0x26   : >> { %v188_v0 = vld [vmem:[%s187_s11] sm:$0x1] }
  0x27   : >> { %190 = vst [vmem:[%s189_s8] sm:$0x1] %v188_v0  ;;  %vm199_vm1 = vcmp.lt.s32.totalorder (%p181_p10), %v198_v16, 16 }
  0x2e   : > { %v191_v1 = vld [vmem:[%s171_s30] sm:$0xff] }
  0x2f   : > { %200 = vmax.xlane.f32.xlu0 %v191_v1 }
  0x45   : > { %211 = vperm.xlu0 %375, %v192_v3  }
  0xb8   : > { %v201_v4 = vpop.xlane.xlu0 %200 }
  0xb9   : > { %v202_v5 = vsub.f32 %v191_v1, %v201_v4 }
  0xbb   : > { %v203_v6 = vmul.f32 1.442695, %v202_v5 }
  0xbd   : > { %376 = vpow2.f32 %v203_v6 }
  0xc0   : > { %v212_v9 = vpop.permute.xlu0 %211 }
  0xc1   : > { %vm213_vm0 = vcmp.eq.s32.totalorder %v194_v8, %v212_v9 }
  0xc2   : > { %v214_v11 = vsel %vm213_vm0, %v191_v1, 0.0 }
  0xca   : > { %v377_v10 = vpop.eup %376 }
  0xcb   : > { %205 = vadd.xlane.f32.xlu1 %v377_v10 }
  0xcf   : > { %215 = vadd.xlane.f32.xlu1 %v214_v11 }
 0x154   : > { %v206_v12 = vpop.xlane.xlu1 %205 }
 0x155   : > { %378 = vlog2.f32 %v206_v12 }
 0x158   : > { %v216_v18 = vpop.xlane.xlu1 %215 }
 0x162   : > { %v379_v15 = vpop.eup %378 }
 0x163   : > { %v208_v17 = vmul.f32 0.6931472, %v379_v15 }
 0x165   : > { %v209_v19 = vadd.f32 %v208_v17, %v201_v4 }
 0x167   : > { %v217_v20 = vsub.f32 %v209_v19, %v216_v18 }
 0x169   : > { %v218_v21 = vsel %vm199_vm1, %v217_v20, 0.0 }
 0x16a   : > { %v221_v22 = vsel %vm220_vm2, %v218_v21, 0.0 }
 0x16b   : > { %222 = vadd.xlane.f32.xlu1 %v221_v22 }
 0x1f4   : > { %v223_v23 = vpop.xlane.xlu1 %222 }
 0x1f5   : > { %v224_v24 = vrot.slane %v223_v23, 4 }
 0x1f7   : > { %v225_v25 = vadd.f32 %v224_v24, %v223_v23 }
 0x1f9   : > { %v226_v26 = vrot.slane %v225_v25, 2 }
 0x1fb   : > { %v227_v27 = vadd.f32 %v226_v26, %v225_v25 }
 0x1fd   : > { %v228_v28 = vrot.slane %v227_v27, 1 }
 0x1ff   : > { %v229_v29 = vadd.f32 %v228_v28, %v227_v27 }
 0x201   : > { %341 = vpush %v229_v29 }
 0x232   : > { %s342_s13 = spop %341 }
 0x233   : > { %s231_s14 = sadd.f32 %s342_s13, %s219_s12 }
 0x235   : > { %233 = sst [smem:[#allocation2]] %s231_s14  ;;  %s241_s15 = smul.f32 0.0625, %s231_s14 }
 0x237   : > { %346 = sst [smem:[#allocation5]] (%p352_p11), %s241_s15 }
 0x238   : > { %348 = dma.smem_to_hbm (%p352_p11), %s427_s16, 16, %s494_s4, [#allocation6]  }
 0x239   : > { %413 = dma.done.wait (%p352_p11), [#allocation6], 16  }
 0x23a   : > { %415 = vsyncadd (%p352_p11), [#allocation6], 4294967280 }
 0x23b   : > { %264 = sfence }
 0x23c PF: > { %s22_s20 = sadd.s32 1, %s418_s20  }
 0x23d   : > { %p19_p12 = scmp.ge.s32.totalorder %s22_s20, 4  }
 0x23f   :  { %21 = sbr.rel (!%p19_p12) target bundleno = 16 (0x10), region = 98 }
 0x244   :  { %277 = vsyncpa [#allocation6], 1 }
 0x245   :  { %279 = vsyncpa [#allocation6 + $0x1], 1 }

</bundles_post_ra>
